<compile_context>
chip_gen: v7x
topology: tpu7x:2x2x1
jax: 0.10.0
libtpu: 0.0.40
codegen_flags: <defaults>
</compile_context>

<pallas_src>
import jax
import jax.numpy as jnp
from jax.experimental import pallas as pl
from jax.experimental.pallas import tpu as pltpu

BN_EPS = 1e-5


def make_conv_bn_relu_kernel(N, C, H, W, KH, KW, OC):
    OH, OW = H - KH + 1, W - KW + 1
    Lv = (OH - 1) * W + OW              # flattened span that holds all valid outputs
    inv_count = 1.0 / float(N * OH * OW)

    def kernel(x_ref, w_ref, gamma_ref, beta_ref, o_ref):
        # x_ref     : (N, C, H*W)    f32
        # w_ref     : (KH*KW, OC, C) f32   (per-tap weight blocks)
        # gamma_ref : (OC, 1)        f32
        # beta_ref  : (OC, 1)        f32
        # o_ref     : (N, OC, Lv)    f32   (lane-dense output slab)

        # Per-lane validity mask: lane p maps to (oh, ow) = divmod(p, W); only ow < OW are
        # real conv outputs, the rest are row wrap-around garbage (excluded from BN stats).
        lane = jax.lax.broadcasted_iota(jnp.int32, (1, Lv), 1)
        valid = (lane % W < OW).astype(jnp.float32)           # (1, Lv)

        accs = []
        s_sum = jnp.zeros((OC, 1), jnp.float32)
        s_sq = jnp.zeros((OC, 1), jnp.float32)
        for n in range(N):                                     # N = 2, static unroll
            acc = jnp.zeros((OC, Lv), jnp.float32)
            for kh in range(KH):
                for kw in range(KW):
                    off = kh * W + kw
                    xs = x_ref[n, :, off:off + Lv]             # (C, Lv) window from VMEM ref
                    wk = w_ref[kh * KW + kw]                   # (OC, C)
                    acc = acc + jnp.dot(wk, xs, preferred_element_type=jnp.float32)
            accs.append(acc)
            masked = acc * valid
            s_sum = s_sum + jnp.sum(masked, axis=1, keepdims=True)
            s_sq = s_sq + jnp.sum(masked * acc, axis=1, keepdims=True)

        # BatchNorm2d, training-mode batch stats (biased variance, eps=1e-5), folded into a
        # single per-channel affine, then ReLU.  (Conv bias omitted: cancels with mean.)
        mean = s_sum * inv_count
        var = s_sq * inv_count - mean * mean
        scale = gamma_ref[...] * jax.lax.rsqrt(var + BN_EPS)   # (OC, 1)
        bias_p = beta_ref[...] - mean * scale                  # (OC, 1)
        for n in range(N):
            y = accs[n] * scale + bias_p
            o_ref[n] = jnp.maximum(y, 0.0).astype(o_ref.dtype)
        # Dropout with drop_rate=0.0 is the identity -> nothing to do.

    return kernel, Lv


def basic_conv_block(x_nchw, w_oihw, bias, gamma, beta):
    """PyTorch-facing wrapper: NCHW in, NCHW out.

    `bias` is accepted for interface parity with Conv2d(bias=True) but is mathematically
    cancelled by the training-mode BatchNorm mean subtraction, so it never reaches the kernel.
    """
    del bias
    N, C, H, W = x_nchw.shape
    OC, _, KH, KW = w_oihw.shape
    OH, OW = H - KH + 1, W - KW + 1

    kernel, Lv = make_conv_bn_relu_kernel(N, C, H, W, KH, KW, OC)

    # Layout glue: contiguous reshape of x (no transpose / copy of the activation), tiny
    # weight repack (OC*C*KH*KW elements), 1-D BN params -> (OC, 1).
    x_flat = x_nchw.reshape(N, C, H * W)
    w_taps = jnp.transpose(w_oihw, (2, 3, 0, 1)).reshape(KH * KW, OC, C)
    g2 = gamma.reshape(OC, 1)
    b2 = beta.reshape(OC, 1)

    vmem = pl.BlockSpec(memory_space=pltpu.MemorySpace.VMEM)
    # Whole problem fits a single VMEM block (~45 KB total); no grid needed at these shapes.
    # TODO(synk): at production sizes add a ("parallel",) grid over N / spatial tiles (and
    # re-derive the tile budget against v7x's 64 MiB VMEM) so both v7x TensorCores are used.
    slab = pl.pallas_call(
        kernel,
        out_shape=jax.ShapeDtypeStruct((N, OC, Lv), x_nchw.dtype),
        in_specs=[vmem, vmem, vmem, vmem],
        out_specs=vmem,
    )(x_flat, w_taps, g2, b2)

    # Strip the (KW-1) wrap-around columns per output row: pad to OH*W, reshape, slice.
    # Pure layout ops on a ~14 KB tensor; XLA fuses them, and there is no transpose.
    pad = OH * W - Lv
    y = jnp.pad(slab, ((0, 0), (0, 0), (0, pad)))
    return y.reshape(N, OC, OH, W)[..., :OW]


def reference(x_nchw, w_oihw, bias, gamma, beta):
    """Pure-JAX reference mirroring the PyTorch forward (training-mode BN, with conv bias)."""
    conv = jax.lax.conv_general_dilated(
        x_nchw, w_oihw, window_strides=(1, 1), padding="VALID",
        dimension_numbers=("NCHW", "OIHW", "NCHW"))
    conv = conv + bias.reshape(1, -1, 1, 1)
    mean = conv.mean(axis=(0, 2, 3), keepdims=True)
    var = ((conv - mean) ** 2).mean(axis=(0, 2, 3), keepdims=True)
    y = (conv - mean) * jax.lax.rsqrt(var + BN_EPS)
    y = y * gamma.reshape(1, -1, 1, 1) + beta.reshape(1, -1, 1, 1)
    return jnp.maximum(y, 0.0)


if __name__ == "__main__":
    # Small, module-consistent shapes: batch=2, in_channels=4, out_channels=8, spatial=16.
    N, C_IN, C_OUT, H, W, K = 2, 4, 8, 16, 16, 3

    key = jax.random.PRNGKey(0)
    kx, kw, kb, kg, kbe = jax.random.split(key, 5)

    x = jax.random.normal(kx, (N, C_IN, H, W), dtype=jnp.float32)
    # Deterministic synthetic parameters (shapes from the module's __init__).
    w = 0.1 * jax.random.normal(kw, (C_OUT, C_IN, K, K), dtype=jnp.float32)   # Conv2d weight
    b = 0.1 * jax.random.normal(kb, (C_OUT,), dtype=jnp.float32)              # Conv2d bias
    gamma = 1.0 + 0.1 * jax.random.normal(kg, (C_OUT,), dtype=jnp.float32)    # BN weight
    beta = 0.1 * jax.random.normal(kbe, (C_OUT,), dtype=jnp.float32)          # BN bias

    out = jax.block_until_ready(basic_conv_block(x, w, b, gamma, beta))
    ref = jax.block_until_ready(reference(x, w, b, gamma, beta))

    assert out.shape == (N, C_OUT, H - K + 1, W - K + 1), out.shape
    err = float(jnp.max(jnp.abs(out - ref)))
    assert jnp.allclose(out, ref, rtol=1e-3, atol=1e-3), err
    print("KERNEL_OK")
</pallas_src>

<mosaic_0001>
module attributes {stable_mosaic.version = 11 : i64} {
  func.func @kernel(%arg0: memref<2x4x256xf32, #tpu.memory_space<vmem>>, %arg1: memref<9x8x4xf32, #tpu.memory_space<vmem>>, %arg2: memref<8x1xf32, #tpu.memory_space<vmem>>, %arg3: memref<8x1xf32, #tpu.memory_space<vmem>>, %arg4: memref<2x8x222xf32, #tpu.memory_space<vmem>>) attributes {dimension_semantics = [], scalar_prefetch = 0 : i64, scratch_operands = 0 : i64, tpu.core_type = #tpu.core_type<tc>} {
    %0 = tpu.iota {dimensions = array<i32: 1>} : vector<1x222xi32>
    %c16_i32 = arith.constant 16 : i32
    %c0_i32 = arith.constant 0 : i32
    %1 = arith.cmpi eq, %c16_i32, %c0_i32 : i32
    %c1_i32 = arith.constant 1 : i32
    %2 = arith.select %1, %c1_i32, %c16_i32 : i32
    %3 = vector.broadcast %2 : i32 to vector<1x222xi32>
    %4 = arith.remsi %0, %3 : vector<1x222xi32>
    %c0_i32_0 = arith.constant 0 : i32
    %5 = vector.broadcast %c0_i32_0 : i32 to vector<1x222xi32>
    %6 = arith.cmpi ne, %4, %5 : vector<1x222xi32>
    %c0_i32_1 = arith.constant 0 : i32
    %7 = vector.broadcast %c0_i32_1 : i32 to vector<1x222xi32>
    %8 = arith.cmpi slt, %4, %7 : vector<1x222xi32>
    %c0_i32_2 = arith.constant 0 : i32
    %9 = arith.cmpi slt, %2, %c0_i32_2 : i32
    %10 = vector.broadcast %9 : i1 to vector<1x222xi1>
    %11 = vector.broadcast %10 : vector<1x222xi1> to vector<1x222xi1>
    %12 = arith.xori %8, %11 : vector<1x222xi1>
    %13 = arith.andi %12, %6 : vector<1x222xi1>
    %14 = vector.broadcast %2 : i32 to vector<1x222xi32>
    %15 = arith.addi %4, %14 : vector<1x222xi32>
    %16 = arith.select %13, %15, %4 : vector<1x222xi1>, vector<1x222xi32>
    %c14_i32 = arith.constant 14 : i32
    %17 = vector.broadcast %c14_i32 : i32 to vector<1x222xi32>
    %18 = arith.cmpi slt, %16, %17 : vector<1x222xi32>
    %19 = arith.extui %18 : vector<1x222xi1> to vector<1x222xi32>
    %20 = arith.sitofp %19 : vector<1x222xi32> to vector<1x222xf32>
    %cst = arith.constant 0.000000e+00 : f32
    %21 = vector.broadcast %cst : f32 to vector<8x1xf32>
    %cst_3 = arith.constant 0.000000e+00 : f32
    %22 = vector.broadcast %cst_3 : f32 to vector<8x1xf32>
    %cst_4 = arith.constant 0.000000e+00 : f32
    %23 = vector.broadcast %cst_4 : f32 to vector<8x222xf32>
    %c0 = arith.constant 0 : index
    %c0_5 = arith.constant 0 : index
    %c0_6 = arith.constant 0 : index
    %24 = vector.load %arg0[%c0, %c0_5, %c0_6] : memref<2x4x256xf32, #tpu.memory_space<vmem>>, vector<1x4x222xf32>
    %25 = vector.shape_cast %24 : vector<1x4x222xf32> to vector<4x222xf32>
    %c0_7 = arith.constant 0 : index
    %c0_8 = arith.constant 0 : index
    %c0_9 = arith.constant 0 : index
    %26 = vector.load %arg1[%c0_7, %c0_8, %c0_9] : memref<9x8x4xf32, #tpu.memory_space<vmem>>, vector<1x8x4xf32>
    %27 = vector.shape_cast %26 : vector<1x8x4xf32> to vector<8x4xf32>
    %cst_10 = arith.constant dense<0.000000e+00> : vector<8x222xf32>
    %28 = tpu.matmul %27, %25, %cst_10 {dimension_numbers = #tpu.dot_dimension_numbers<[1], [0], [0], [1], [0, 0, 1, 1], [], []>} : vector<8x4xf32>, vector<4x222xf32>, vector<8x222xf32> -> vector<8x222xf32>
    %29 = arith.addf %23, %28 : vector<8x222xf32>
    %c0_11 = arith.constant 0 : index
    %c0_12 = arith.constant 0 : index
    %c1 = arith.constant 1 : index
    %30 = vector.load %arg0[%c0_11, %c0_12, %c1] : memref<2x4x256xf32, #tpu.memory_space<vmem>>, vector<1x4x222xf32>
    %31 = vector.shape_cast %30 : vector<1x4x222xf32> to vector<4x222xf32>
    %c1_13 = arith.constant 1 : index
    %c0_14 = arith.constant 0 : index
    %c0_15 = arith.constant 0 : index
    %32 = vector.load %arg1[%c1_13, %c0_14, %c0_15] : memref<9x8x4xf32, #tpu.memory_space<vmem>>, vector<1x8x4xf32>
    %33 = vector.shape_cast %32 : vector<1x8x4xf32> to vector<8x4xf32>
    %cst_16 = arith.constant dense<0.000000e+00> : vector<8x222xf32>
    %34 = tpu.matmul %33, %31, %cst_16 {dimension_numbers = #tpu.dot_dimension_numbers<[1], [0], [0], [1], [0, 0, 1, 1], [], []>} : vector<8x4xf32>, vector<4x222xf32>, vector<8x222xf32> -> vector<8x222xf32>
    %35 = arith.addf %29, %34 : vector<8x222xf32>
    %c0_17 = arith.constant 0 : index
    %c0_18 = arith.constant 0 : index
    %c2 = arith.constant 2 : index
    %36 = vector.load %arg0[%c0_17, %c0_18, %c2] : memref<2x4x256xf32, #tpu.memory_space<vmem>>, vector<1x4x222xf32>
    %37 = vector.shape_cast %36 : vector<1x4x222xf32> to vector<4x222xf32>
    %c2_19 = arith.constant 2 : index
    %c0_20 = arith.constant 0 : index
    %c0_21 = arith.constant 0 : index
    %38 = vector.load %arg1[%c2_19, %c0_20, %c0_21] : memref<9x8x4xf32, #tpu.memory_space<vmem>>, vector<1x8x4xf32>
    %39 = vector.shape_cast %38 : vector<1x8x4xf32> to vector<8x4xf32>
    %cst_22 = arith.constant dense<0.000000e+00> : vector<8x222xf32>
    %40 = tpu.matmul %39, %37, %cst_22 {dimension_numbers = #tpu.dot_dimension_numbers<[1], [0], [0], [1], [0, 0, 1, 1], [], []>} : vector<8x4xf32>, vector<4x222xf32>, vector<8x222xf32> -> vector<8x222xf32>
    %41 = arith.addf %35, %40 : vector<8x222xf32>
    %c0_23 = arith.constant 0 : index
    %c0_24 = arith.constant 0 : index
    %c16 = arith.constant 16 : index
    %42 = vector.load %arg0[%c0_23, %c0_24, %c16] : memref<2x4x256xf32, #tpu.memory_space<vmem>>, vector<1x4x222xf32>
    %43 = vector.shape_cast %42 : vector<1x4x222xf32> to vector<4x222xf32>
    %c3 = arith.constant 3 : index
    %c0_25 = arith.constant 0 : index
    %c0_26 = arith.constant 0 : index
    %44 = vector.load %arg1[%c3, %c0_25, %c0_26] : memref<9x8x4xf32, #tpu.memory_space<vmem>>, vector<1x8x4xf32>
    %45 = vector.shape_cast %44 : vector<1x8x4xf32> to vector<8x4xf32>
    %cst_27 = arith.constant dense<0.000000e+00> : vector<8x222xf32>
    %46 = tpu.matmul %45, %43, %cst_27 {dimension_numbers = #tpu.dot_dimension_numbers<[1], [0], [0], [1], [0, 0, 1, 1], [], []>} : vector<8x4xf32>, vector<4x222xf32>, vector<8x222xf32> -> vector<8x222xf32>
    %47 = arith.addf %41, %46 : vector<8x222xf32>
    %c0_28 = arith.constant 0 : index
    %c0_29 = arith.constant 0 : index
    %c17 = arith.constant 17 : index
    %48 = vector.load %arg0[%c0_28, %c0_29, %c17] : memref<2x4x256xf32, #tpu.memory_space<vmem>>, vector<1x4x222xf32>
    %49 = vector.shape_cast %48 : vector<1x4x222xf32> to vector<4x222xf32>
    %c4 = arith.constant 4 : index
    %c0_30 = arith.constant 0 : index
    %c0_31 = arith.constant 0 : index
    %50 = vector.load %arg1[%c4, %c0_30, %c0_31] : memref<9x8x4xf32, #tpu.memory_space<vmem>>, vector<1x8x4xf32>
    %51 = vector.shape_cast %50 : vector<1x8x4xf32> to vector<8x4xf32>
    %cst_32 = arith.constant dense<0.000000e+00> : vector<8x222xf32>
    %52 = tpu.matmul %51, %49, %cst_32 {dimension_numbers = #tpu.dot_dimension_numbers<[1], [0], [0], [1], [0, 0, 1, 1], [], []>} : vector<8x4xf32>, vector<4x222xf32>, vector<8x222xf32> -> vector<8x222xf32>
    %53 = arith.addf %47, %52 : vector<8x222xf32>
    %c0_33 = arith.constant 0 : index
    %c0_34 = arith.constant 0 : index
    %c18 = arith.constant 18 : index
    %54 = vector.load %arg0[%c0_33, %c0_34, %c18] : memref<2x4x256xf32, #tpu.memory_space<vmem>>, vector<1x4x222xf32>
    %55 = vector.shape_cast %54 : vector<1x4x222xf32> to vector<4x222xf32>
    %c5 = arith.constant 5 : index
    %c0_35 = arith.constant 0 : index
    %c0_36 = arith.constant 0 : index
    %56 = vector.load %arg1[%c5, %c0_35, %c0_36] : memref<9x8x4xf32, #tpu.memory_space<vmem>>, vector<1x8x4xf32>
    %57 = vector.shape_cast %56 : vector<1x8x4xf32> to vector<8x4xf32>
    %cst_37 = arith.constant dense<0.000000e+00> : vector<8x222xf32>
    %58 = tpu.matmul %57, %55, %cst_37 {dimension_numbers = #tpu.dot_dimension_numbers<[1], [0], [0], [1], [0, 0, 1, 1], [], []>} : vector<8x4xf32>, vector<4x222xf32>, vector<8x222xf32> -> vector<8x222xf32>
    %59 = arith.addf %53, %58 : vector<8x222xf32>
    %c0_38 = arith.constant 0 : index
    %c0_39 = arith.constant 0 : index
    %c32 = arith.constant 32 : index
    %60 = vector.load %arg0[%c0_38, %c0_39, %c32] : memref<2x4x256xf32, #tpu.memory_space<vmem>>, vector<1x4x222xf32>
    %61 = vector.shape_cast %60 : vector<1x4x222xf32> to vector<4x222xf32>
    %c6 = arith.constant 6 : index
    %c0_40 = arith.constant 0 : index
    %c0_41 = arith.constant 0 : index
    %62 = vector.load %arg1[%c6, %c0_40, %c0_41] : memref<9x8x4xf32, #tpu.memory_space<vmem>>, vector<1x8x4xf32>
    %63 = vector.shape_cast %62 : vector<1x8x4xf32> to vector<8x4xf32>
    %cst_42 = arith.constant dense<0.000000e+00> : vector<8x222xf32>
    %64 = tpu.matmul %63, %61, %cst_42 {dimension_numbers = #tpu.dot_dimension_numbers<[1], [0], [0], [1], [0, 0, 1, 1], [], []>} : vector<8x4xf32>, vector<4x222xf32>, vector<8x222xf32> -> vector<8x222xf32>
    %65 = arith.addf %59, %64 : vector<8x222xf32>
    %c0_43 = arith.constant 0 : index
    %c0_44 = arith.constant 0 : index
    %c33 = arith.constant 33 : index
    %66 = vector.load %arg0[%c0_43, %c0_44, %c33] : memref<2x4x256xf32, #tpu.memory_space<vmem>>, vector<1x4x222xf32>
    %67 = vector.shape_cast %66 : vector<1x4x222xf32> to vector<4x222xf32>
    %c7 = arith.constant 7 : index
    %c0_45 = arith.constant 0 : index
    %c0_46 = arith.constant 0 : index
    %68 = vector.load %arg1[%c7, %c0_45, %c0_46] : memref<9x8x4xf32, #tpu.memory_space<vmem>>, vector<1x8x4xf32>
    %69 = vector.shape_cast %68 : vector<1x8x4xf32> to vector<8x4xf32>
    %cst_47 = arith.constant dense<0.000000e+00> : vector<8x222xf32>
    %70 = tpu.matmul %69, %67, %cst_47 {dimension_numbers = #tpu.dot_dimension_numbers<[1], [0], [0], [1], [0, 0, 1, 1], [], []>} : vector<8x4xf32>, vector<4x222xf32>, vector<8x222xf32> -> vector<8x222xf32>
    %71 = arith.addf %65, %70 : vector<8x222xf32>
    %c0_48 = arith.constant 0 : index
    %c0_49 = arith.constant 0 : index
    %c34 = arith.constant 34 : index
    %72 = vector.load %arg0[%c0_48, %c0_49, %c34] : memref<2x4x256xf32, #tpu.memory_space<vmem>>, vector<1x4x222xf32>
    %73 = vector.shape_cast %72 : vector<1x4x222xf32> to vector<4x222xf32>
    %c8 = arith.constant 8 : index
    %c0_50 = arith.constant 0 : index
    %c0_51 = arith.constant 0 : index
    %74 = vector.load %arg1[%c8, %c0_50, %c0_51] : memref<9x8x4xf32, #tpu.memory_space<vmem>>, vector<1x8x4xf32>
    %75 = vector.shape_cast %74 : vector<1x8x4xf32> to vector<8x4xf32>
    %cst_52 = arith.constant dense<0.000000e+00> : vector<8x222xf32>
    %76 = tpu.matmul %75, %73, %cst_52 {dimension_numbers = #tpu.dot_dimension_numbers<[1], [0], [0], [1], [0, 0, 1, 1], [], []>} : vector<8x4xf32>, vector<4x222xf32>, vector<8x222xf32> -> vector<8x222xf32>
    %77 = arith.addf %71, %76 : vector<8x222xf32>
    %78 = vector.broadcast %20 : vector<1x222xf32> to vector<8x222xf32>
    %79 = arith.mulf %77, %78 : vector<8x222xf32>
    %cst_53 = arith.constant dense<0.000000e+00> : vector<8xf32>
    %80 = vector.multi_reduction <add>, %79, %cst_53 [1] : vector<8x222xf32> to vector<8xf32>
    %81 = vector.shape_cast %80 : vector<8xf32> to vector<8x1xf32>
    %82 = arith.addf %21, %81 : vector<8x1xf32>
    %83 = arith.mulf %79, %77 : vector<8x222xf32>
    %cst_54 = arith.constant dense<0.000000e+00> : vector<8xf32>
    %84 = vector.multi_reduction <add>, %83, %cst_54 [1] : vector<8x222xf32> to vector<8xf32>
    %85 = vector.shape_cast %84 : vector<8xf32> to vector<8x1xf32>
    %86 = arith.addf %22, %85 : vector<8x1xf32>
    %cst_55 = arith.constant 0.000000e+00 : f32
    %87 = vector.broadcast %cst_55 : f32 to vector<8x222xf32>
    %c1_56 = arith.constant 1 : index
    %c0_57 = arith.constant 0 : index
    %c0_58 = arith.constant 0 : index
    %88 = vector.load %arg0[%c1_56, %c0_57, %c0_58] : memref<2x4x256xf32, #tpu.memory_space<vmem>>, vector<1x4x222xf32>
    %89 = vector.shape_cast %88 : vector<1x4x222xf32> to vector<4x222xf32>
    %c0_59 = arith.constant 0 : index
    %c0_60 = arith.constant 0 : index
    %c0_61 = arith.constant 0 : index
    %90 = vector.load %arg1[%c0_59, %c0_60, %c0_61] : memref<9x8x4xf32, #tpu.memory_space<vmem>>, vector<1x8x4xf32>
    %91 = vector.shape_cast %90 : vector<1x8x4xf32> to vector<8x4xf32>
    %cst_62 = arith.constant dense<0.000000e+00> : vector<8x222xf32>
    %92 = tpu.matmul %91, %89, %cst_62 {dimension_numbers = #tpu.dot_dimension_numbers<[1], [0], [0], [1], [0, 0, 1, 1], [], []>} : vector<8x4xf32>, vector<4x222xf32>, vector<8x222xf32> -> vector<8x222xf32>
    %93 = arith.addf %87, %92 : vector<8x222xf32>
    %c1_63 = arith.constant 1 : index
    %c0_64 = arith.constant 0 : index
    %c1_65 = arith.constant 1 : index
    %94 = vector.load %arg0[%c1_63, %c0_64, %c1_65] : memref<2x4x256xf32, #tpu.memory_space<vmem>>, vector<1x4x222xf32>
    %95 = vector.shape_cast %94 : vector<1x4x222xf32> to vector<4x222xf32>
    %c1_66 = arith.constant 1 : index
    %c0_67 = arith.constant 0 : index
    %c0_68 = arith.constant 0 : index
    %96 = vector.load %arg1[%c1_66, %c0_67, %c0_68] : memref<9x8x4xf32, #tpu.memory_space<vmem>>, vector<1x8x4xf32>
    %97 = vector.shape_cast %96 : vector<1x8x4xf32> to vector<8x4xf32>
    %cst_69 = arith.constant dense<0.000000e+00> : vector<8x222xf32>
    %98 = tpu.matmul %97, %95, %cst_69 {dimension_numbers = #tpu.dot_dimension_numbers<[1], [0], [0], [1], [0, 0, 1, 1], [], []>} : vector<8x4xf32>, vector<4x222xf32>, vector<8x222xf32> -> vector<8x222xf32>
    %99 = arith.addf %93, %98 : vector<8x222xf32>
    %c1_70 = arith.constant 1 : index
    %c0_71 = arith.constant 0 : index
    %c2_72 = arith.constant 2 : index
    %100 = vector.load %arg0[%c1_70, %c0_71, %c2_72] : memref<2x4x256xf32, #tpu.memory_space<vmem>>, vector<1x4x222xf32>
    %101 = vector.shape_cast %100 : vector<1x4x222xf32> to vector<4x222xf32>
    %c2_73 = arith.constant 2 : index
    %c0_74 = arith.constant 0 : index
    %c0_75 = arith.constant 0 : index
    %102 = vector.load %arg1[%c2_73, %c0_74, %c0_75] : memref<9x8x4xf32, #tpu.memory_space<vmem>>, vector<1x8x4xf32>
    %103 = vector.shape_cast %102 : vector<1x8x4xf32> to vector<8x4xf32>
    %cst_76 = arith.constant dense<0.000000e+00> : vector<8x222xf32>
    %104 = tpu.matmul %103, %101, %cst_76 {dimension_numbers = #tpu.dot_dimension_numbers<[1], [0], [0], [1], [0, 0, 1, 1], [], []>} : vector<8x4xf32>, vector<4x222xf32>, vector<8x222xf32> -> vector<8x222xf32>
    %105 = arith.addf %99, %104 : vector<8x222xf32>
    %c1_77 = arith.constant 1 : index
    %c0_78 = arith.constant 0 : index
    %c16_79 = arith.constant 16 : index
    %106 = vector.load %arg0[%c1_77, %c0_78, %c16_79] : memref<2x4x256xf32, #tpu.memory_space<vmem>>, vector<1x4x222xf32>
    %107 = vector.shape_cast %106 : vector<1x4x222xf32> to vector<4x222xf32>
    %c3_80 = arith.constant 3 : index
    %c0_81 = arith.constant 0 : index
    %c0_82 = arith.constant 0 : index
    %108 = vector.load %arg1[%c3_80, %c0_81, %c0_82] : memref<9x8x4xf32, #tpu.memory_space<vmem>>, vector<1x8x4xf32>
    %109 = vector.shape_cast %108 : vector<1x8x4xf32> to vector<8x4xf32>
    %cst_83 = arith.constant dense<0.000000e+00> : vector<8x222xf32>
    %110 = tpu.matmul %109, %107, %cst_83 {dimension_numbers = #tpu.dot_dimension_numbers<[1], [0], [0], [1], [0, 0, 1, 1], [], []>} : vector<8x4xf32>, vector<4x222xf32>, vector<8x222xf32> -> vector<8x222xf32>
    %111 = arith.addf %105, %110 : vector<8x222xf32>
    %c1_84 = arith.constant 1 : index
    %c0_85 = arith.constant 0 : index
    %c17_86 = arith.constant 17 : index
    %112 = vector.load %arg0[%c1_84, %c0_85, %c17_86] : memref<2x4x256xf32, #tpu.memory_space<vmem>>, vector<1x4x222xf32>
    %113 = vector.shape_cast %112 : vector<1x4x222xf32> to vector<4x222xf32>
    %c4_87 = arith.constant 4 : index
    %c0_88 = arith.constant 0 : index
    %c0_89 = arith.constant 0 : index
    %114 = vector.load %arg1[%c4_87, %c0_88, %c0_89] : memref<9x8x4xf32, #tpu.memory_space<vmem>>, vector<1x8x4xf32>
    %115 = vector.shape_cast %114 : vector<1x8x4xf32> to vector<8x4xf32>
    %cst_90 = arith.constant dense<0.000000e+00> : vector<8x222xf32>
    %116 = tpu.matmul %115, %113, %cst_90 {dimension_numbers = #tpu.dot_dimension_numbers<[1], [0], [0], [1], [0, 0, 1, 1], [], []>} : vector<8x4xf32>, vector<4x222xf32>, vector<8x222xf32> -> vector<8x222xf32>
    %117 = arith.addf %111, %116 : vector<8x222xf32>
    %c1_91 = arith.constant 1 : index
    %c0_92 = arith.constant 0 : index
    %c18_93 = arith.constant 18 : index
    %118 = vector.load %arg0[%c1_91, %c0_92, %c18_93] : memref<2x4x256xf32, #tpu.memory_space<vmem>>, vector<1x4x222xf32>
    %119 = vector.shape_cast %118 : vector<1x4x222xf32> to vector<4x222xf32>
    %c5_94 = arith.constant 5 : index
    %c0_95 = arith.constant 0 : index
    %c0_96 = arith.constant 0 : index
    %120 = vector.load %arg1[%c5_94, %c0_95, %c0_96] : memref<9x8x4xf32, #tpu.memory_space<vmem>>, vector<1x8x4xf32>
    %121 = vector.shape_cast %120 : vector<1x8x4xf32> to vector<8x4xf32>
    %cst_97 = arith.constant dense<0.000000e+00> : vector<8x222xf32>
    %122 = tpu.matmul %121, %119, %cst_97 {dimension_numbers = #tpu.dot_dimension_numbers<[1], [0], [0], [1], [0, 0, 1, 1], [], []>} : vector<8x4xf32>, vector<4x222xf32>, vector<8x222xf32> -> vector<8x222xf32>
    %123 = arith.addf %117, %122 : vector<8x222xf32>
    %c1_98 = arith.constant 1 : index
    %c0_99 = arith.constant 0 : index
    %c32_100 = arith.constant 32 : index
    %124 = vector.load %arg0[%c1_98, %c0_99, %c32_100] : memref<2x4x256xf32, #tpu.memory_space<vmem>>, vector<1x4x222xf32>
    %125 = vector.shape_cast %124 : vector<1x4x222xf32> to vector<4x222xf32>
    %c6_101 = arith.constant 6 : index
    %c0_102 = arith.constant 0 : index
    %c0_103 = arith.constant 0 : index
    %126 = vector.load %arg1[%c6_101, %c0_102, %c0_103] : memref<9x8x4xf32, #tpu.memory_space<vmem>>, vector<1x8x4xf32>
    %127 = vector.shape_cast %126 : vector<1x8x4xf32> to vector<8x4xf32>
    %cst_104 = arith.constant dense<0.000000e+00> : vector<8x222xf32>
    %128 = tpu.matmul %127, %125, %cst_104 {dimension_numbers = #tpu.dot_dimension_numbers<[1], [0], [0], [1], [0, 0, 1, 1], [], []>} : vector<8x4xf32>, vector<4x222xf32>, vector<8x222xf32> -> vector<8x222xf32>
    %129 = arith.addf %123, %128 : vector<8x222xf32>
    %c1_105 = arith.constant 1 : index
    %c0_106 = arith.constant 0 : index
    %c33_107 = arith.constant 33 : index
    %130 = vector.load %arg0[%c1_105, %c0_106, %c33_107] : memref<2x4x256xf32, #tpu.memory_space<vmem>>, vector<1x4x222xf32>
    %131 = vector.shape_cast %130 : vector<1x4x222xf32> to vector<4x222xf32>
    %c7_108 = arith.constant 7 : index
    %c0_109 = arith.constant 0 : index
    %c0_110 = arith.constant 0 : index
    %132 = vector.load %arg1[%c7_108, %c0_109, %c0_110] : memref<9x8x4xf32, #tpu.memory_space<vmem>>, vector<1x8x4xf32>
    %133 = vector.shape_cast %132 : vector<1x8x4xf32> to vector<8x4xf32>
    %cst_111 = arith.constant dense<0.000000e+00> : vector<8x222xf32>
    %134 = tpu.matmul %133, %131, %cst_111 {dimension_numbers = #tpu.dot_dimension_numbers<[1], [0], [0], [1], [0, 0, 1, 1], [], []>} : vector<8x4xf32>, vector<4x222xf32>, vector<8x222xf32> -> vector<8x222xf32>
    %135 = arith.addf %129, %134 : vector<8x222xf32>
    %c1_112 = arith.constant 1 : index
    %c0_113 = arith.constant 0 : index
    %c34_114 = arith.constant 34 : index
    %136 = vector.load %arg0[%c1_112, %c0_113, %c34_114] : memref<2x4x256xf32, #tpu.memory_space<vmem>>, vector<1x4x222xf32>
    %137 = vector.shape_cast %136 : vector<1x4x222xf32> to vector<4x222xf32>
    %c8_115 = arith.constant 8 : index
    %c0_116 = arith.constant 0 : index
    %c0_117 = arith.constant 0 : index
    %138 = vector.load %arg1[%c8_115, %c0_116, %c0_117] : memref<9x8x4xf32, #tpu.memory_space<vmem>>, vector<1x8x4xf32>
    %139 = vector.shape_cast %138 : vector<1x8x4xf32> to vector<8x4xf32>
    %cst_118 = arith.constant dense<0.000000e+00> : vector<8x222xf32>
    %140 = tpu.matmul %139, %137, %cst_118 {dimension_numbers = #tpu.dot_dimension_numbers<[1], [0], [0], [1], [0, 0, 1, 1], [], []>} : vector<8x4xf32>, vector<4x222xf32>, vector<8x222xf32> -> vector<8x222xf32>
    %141 = arith.addf %135, %140 : vector<8x222xf32>
    %142 = vector.broadcast %20 : vector<1x222xf32> to vector<8x222xf32>
    %143 = arith.mulf %141, %142 : vector<8x222xf32>
    %cst_119 = arith.constant dense<0.000000e+00> : vector<8xf32>
    %144 = vector.multi_reduction <add>, %143, %cst_119 [1] : vector<8x222xf32> to vector<8xf32>
    %145 = vector.shape_cast %144 : vector<8xf32> to vector<8x1xf32>
    %146 = arith.addf %82, %145 : vector<8x1xf32>
    %147 = arith.mulf %143, %141 : vector<8x222xf32>
    %cst_120 = arith.constant dense<0.000000e+00> : vector<8xf32>
    %148 = vector.multi_reduction <add>, %147, %cst_120 [1] : vector<8x222xf32> to vector<8xf32>
    %149 = vector.shape_cast %148 : vector<8xf32> to vector<8x1xf32>
    %150 = arith.addf %86, %149 : vector<8x1xf32>
    %cst_121 = arith.constant 0.00255102036 : f32
    %151 = vector.broadcast %cst_121 : f32 to vector<8x1xf32>
    %152 = arith.mulf %146, %151 : vector<8x1xf32>
    %cst_122 = arith.constant 0.00255102036 : f32
    %153 = vector.broadcast %cst_122 : f32 to vector<8x1xf32>
    %154 = arith.mulf %150, %153 : vector<8x1xf32>
    %155 = arith.mulf %152, %152 : vector<8x1xf32>
    %156 = arith.subf %154, %155 : vector<8x1xf32>
    %c0_123 = arith.constant 0 : index
    %c0_124 = arith.constant 0 : index
    %157 = vector.load %arg2[%c0_123, %c0_124] : memref<8x1xf32, #tpu.memory_space<vmem>>, vector<8x1xf32>
    %cst_125 = arith.constant 9.99999974E-6 : f32
    %158 = vector.broadcast %cst_125 : f32 to vector<8x1xf32>
    %159 = arith.addf %156, %158 : vector<8x1xf32>
    %160 = math.rsqrt %159 : vector<8x1xf32>
    %161 = arith.mulf %157, %160 : vector<8x1xf32>
    %c0_126 = arith.constant 0 : index
    %c0_127 = arith.constant 0 : index
    %162 = vector.load %arg3[%c0_126, %c0_127] : memref<8x1xf32, #tpu.memory_space<vmem>>, vector<8x1xf32>
    %163 = arith.mulf %152, %161 : vector<8x1xf32>
    %164 = arith.subf %162, %163 : vector<8x1xf32>
    %165 = vector.broadcast %161 : vector<8x1xf32> to vector<8x222xf32>
    %166 = arith.mulf %77, %165 : vector<8x222xf32>
    %167 = vector.broadcast %164 : vector<8x1xf32> to vector<8x222xf32>
    %168 = arith.addf %166, %167 : vector<8x222xf32>
    %cst_128 = arith.constant 0.000000e+00 : f32
    %169 = vector.broadcast %cst_128 : f32 to vector<8x222xf32>
    %170 = arith.maximumf %168, %169 : vector<8x222xf32>
    %c0_129 = arith.constant 0 : index
    %c0_130 = arith.constant 0 : index
    %c0_131 = arith.constant 0 : index
    %171 = vector.load %arg4[%c0_129, %c0_130, %c0_131] : memref<2x8x222xf32, #tpu.memory_space<vmem>>, vector<1x8x222xf32>
    %172 = vector.shape_cast %171 : vector<1x8x222xf32> to vector<8x222xf32>
    %173 = vector.shape_cast %170 : vector<8x222xf32> to vector<1x8x222xf32>
    tpu.vector_store %arg4[%c0_129, %c0_130, %c0_131], %173 {strides = array<i32>} : memref<2x8x222xf32, #tpu.memory_space<vmem>>, vector<1x8x222xf32>,
    %174 = vector.broadcast %161 : vector<8x1xf32> to vector<8x222xf32>
    %175 = arith.mulf %141, %174 : vector<8x222xf32>
    %176 = vector.broadcast %164 : vector<8x1xf32> to vector<8x222xf32>
    %177 = arith.addf %175, %176 : vector<8x222xf32>
    %cst_132 = arith.constant 0.000000e+00 : f32
    %178 = vector.broadcast %cst_132 : f32 to vector<8x222xf32>
    %179 = arith.maximumf %177, %178 : vector<8x222xf32>
    %c1_133 = arith.constant 1 : index
    %c0_134 = arith.constant 0 : index
    %c0_135 = arith.constant 0 : index
    %180 = vector.load %arg4[%c1_133, %c0_134, %c0_135] : memref<2x8x222xf32, #tpu.memory_space<vmem>>, vector<1x8x222xf32>
    %181 = vector.shape_cast %180 : vector<1x8x222xf32> to vector<8x222xf32>
    %182 = vector.shape_cast %179 : vector<8x222xf32> to vector<1x8x222xf32>
    tpu.vector_store %arg4[%c1_133, %c0_134, %c0_135], %182 {strides = array<i32>} : memref<2x8x222xf32, #tpu.memory_space<vmem>>, vector<1x8x222xf32>,
    return
  }
}

</mosaic_0001>

<bundles_post_ra>
// kernel: tpu_custom_call.1
= control target key start
LH: loop header
LB: loop body
LE: loop exit
PB: predicated region body
PF: predicated region fallthrough
CT: control target
= control target key end

     0   :  { %s1841_s19 = smov 127   ;;  %v1842_v4 = vmov 0.0   ;;  %s2049_s0 = inlined_call_operand.vmem [shape: f32[2,4,256], index: 0, kind: input, shape index: {}]   ;;  %s2050_s1 = inlined_call_operand.vmem [shape: f32[9,8,4], index: 1, kind: input, shape index: {}]   ;;  %s2051_s2 = inlined_call_operand.vmem [shape: f32[8,1], index: 2, kind: input, shape index: {}]   ;;  %s2052_s3 = inlined_call_operand.vmem [shape: f32[8,1], index: 3, kind: input, shape index: {}]   ;;  %s2053_s4 = inlined_call_operand.hbm [shape: f32[2,8,222], index: 4, kind: output, shape index: {}]  }
   0x1   :  { %v1882_v0 = vld [vmem:[%s2049_s0 + $0x8] sm:$0xff]  ;;  %v1887_v1 = vld [vmem:[%s2049_s0] sm:$0xff]  ;;  %136 = vmatprep.mubr.f32.mxu0 %v1842_v4  ;;  %949 = vmatprep.mubr.f32.mxu1 %v1842_v4 }
   0x2   :  { %876 = vrot.lane.b32.xlu1 %v1882_v0, %s1841_s19  ;;  %57 = vrot.lane.b32.xlu0 %v1887_v1, %s1841_s19  ;;  %v1893_v2 = vcombine.high %v1882_v0, %v1882_v0  ;;  %v56_v3 = vcombine.high %v1887_v1, %v1887_v1 }
   0x3   :  { %9 = vsyncpa [#allocation3], 0  ;;  %s1843_s0 = smov 126   ;;  %s1844_s20 = smov 112   ;;  %vm67_vm0 = vcmask 1043456   ;;  %vm61_vm1 = vcmask 1039360   ;;  %v18_v62 = vlaneseq }
   0x4   :  { %s1845_s21 = smov 111   ;;  %s1846_s22 = smov 110   ;;  %v1696_v9 = vld [vmem:[%s2050_s1 + $0x8] sm:$0xff]  ;;  %vm63_vm2 = vcmask 31744   ;;  %vm230_vm3 = vcmask 1031168   ;;  %v52_v14 = vld [vmem:[%s2050_s1] sm:$0xff] }
   0x5   :  { %s1847_s23 = smov 96   ;;  %s1848_s24 = smov 95   ;;  %vm321_vm4 = vcmask 916480   ;;  %v1703_v21 = vld [vmem:[%s2050_s1 + $0x10] sm:$0xff]  ;;  %vm412_vm5 = vcmask 908288   ;;  %v1707_v28 = vld [vmem:[%s2050_s1 + $0x18] sm:$0xff] }
   0x6   :  { %878 = vrot.lane.b32.xlu1 %v1893_v2, %s1841_s19  ;;  %59 = vrot.lane.b32.xlu0 %v56_v3, %s1841_s19  ;;  %s1849_s25 = smov 94   ;;  %vm503_vm6 = vcmask 900096   ;;  %v1711_v35 = vld [vmem:[%s2050_s1 + $0x20] sm:$0xff]  ;;  %vm594_vm7 = vcmask 785408   ;;  %v1715_v42 = vld [vmem:[%s2050_s1 + $0x28] sm:$0xff]  ;;  %vm685_vm8 = vcmask 777216  }
   0x7   :  { %v1719_v49 = vld [vmem:[%s2050_s1 + $0x30] sm:$0xff]  ;;  %vm776_vm9 = vcmask 769024   ;;  %v1723_v56 = vld [vmem:[%s2050_s1 + $0x38] sm:$0xff]  ;;  %v1727_v61 = vld [vmem:[%s2050_s1 + $0x40] sm:$0xff]  ;;  %v19_v63 = vand.u32 127, %v18_v62 }
   0xa   :  { %228 = vrot.lane.b32.xlu1 %v56_v3, %s1843_s0  ;;  %226 = vrot.lane.b32.xlu0 %v1887_v1, %s1843_s0 }
   0xe   :  { %1036 = vrot.lane.b32.xlu1 %v1893_v2, %s1843_s0  ;;  %1034 = vrot.lane.b32.xlu0 %v1882_v0, %s1843_s0 }
  0x12   :  { %319 = vrot.lane.b32.xlu1 %v56_v3, %s1844_s20  ;;  %317 = vrot.lane.b32.xlu0 %v1887_v1, %s1844_s20 }
  0x16   :  { %1121 = vrot.lane.b32.xlu1 %v1893_v2, %s1844_s20  ;;  %1119 = vrot.lane.b32.xlu0 %v1882_v0, %s1844_s20  ;;  %s1851_s20 = smov [#allocation2]  }
  0x1a   :  { %410 = vrot.lane.b32.xlu1 %v56_v3, %s1845_s21  ;;  %408 = vrot.lane.b32.xlu0 %v1887_v1, %s1845_s21 }
  0x1e   :  { %1206 = vrot.lane.b32.xlu1 %v1893_v2, %s1845_s21  ;;  %1204 = vrot.lane.b32.xlu0 %v1882_v0, %s1845_s21  ;;  %s1683_s21 = sshll.u32 %s1851_s20, 4  ;;  %s1684_s21 = int_to_ptr.vmem [resolvable:$true] %s1683_s21 }
  0x1f   :  { %p1822_p1 = scmp.lt.s32.totalorder %s1684_s21, %s1684_s21 }
  0x22   :  { %501 = vrot.lane.b32.xlu1 %v56_v3, %s1846_s22  ;;  %499 = vrot.lane.b32.xlu0 %v1887_v1, %s1846_s22 }
  0x26   :  { %1291 = vrot.lane.b32.xlu1 %v1893_v2, %s1846_s22  ;;  %1289 = vrot.lane.b32.xlu0 %v1882_v0, %s1846_s22 }
  0x2a   :  { %592 = vrot.lane.b32.xlu1 %v56_v3, %s1847_s23  ;;  %590 = vrot.lane.b32.xlu0 %v1887_v1, %s1847_s23 }
  0x2e   :  { %1376 = vrot.lane.b32.xlu1 %v1893_v2, %s1847_s23  ;;  %1374 = vrot.lane.b32.xlu0 %v1882_v0, %s1847_s23 }
  0x32   :  { %683 = vrot.lane.b32.xlu1 %v56_v3, %s1848_s24  ;;  %681 = vrot.lane.b32.xlu0 %v1887_v1, %s1848_s24 }
  0x36   :  { %1461 = vrot.lane.b32.xlu1 %v1893_v2, %s1848_s24  ;;  %1459 = vrot.lane.b32.xlu0 %v1882_v0, %s1848_s24 }
  0x3a   :  { %774 = vrot.lane.b32.xlu1 %v56_v3, %s1849_s25  ;;  %772 = vrot.lane.b32.xlu0 %v1887_v1, %s1849_s25 }
  0x3e   :  { %1546 = vrot.lane.b32.xlu1 %v1893_v2, %s1849_s25  ;;  %1544 = vrot.lane.b32.xlu0 %v1882_v0, %s1849_s25 }
  0x74   :  { %v877_v5 = vpop.permute.xlu1 %876  ;;  %v58_v6 = vpop.permute.xlu0 %57 }
  0x78   :  { %v879_v7 = vpop.permute.xlu1 %878  ;;  %v60_v8 = vpop.permute.xlu0 %59 }
  0x79   :  { %1697 = vmatprep.subr.msk.mxu0 %vm67_vm0, %v60_v8  ;;  %1732 = vmatprep.subr.msk.mxu1 %vm67_vm0, %v879_v7  ;;  %v62_v10 = vsel %vm61_vm1, %v58_v6, %v60_v8  ;;  %v880_v11 = vsel %vm61_vm1, %v877_v5, %v879_v7 }
  0x7a   :  { %1698 = vmatpush1.msk.msra.mxu0 %vm67_vm0, %v62_v10  ;;  %1733 = vmatpush1.msk.msra.mxu1 %vm67_vm0, %v880_v11 }
  0x7b   :  { %1699 = vmatmul.mubr.msk.f32.vlgmr.msra.gmra.mrb[0].mxu0 %vm63_vm2, %v1696_v9  ;;  %1700 = vmatprep.subr.msk.mxu0 %vm67_vm0, %v56_v3 }
  0x7c   :  { %1734 = vmatmul.mubr.msk.f32.vlgmr.msra.gmra.mrb[0].mxu1 %vm63_vm2, %v1696_v9  ;;  %1701 = vmatpush1.msk.msra.mxu0 %vm67_vm0, %v1887_v1  ;;  %v229_v12 = vpop.permute.xlu1 %228  ;;  %v227_v13 = vpop.permute.xlu0 %226  ;;  %v25_v1 = vand.u32 15, %v19_v63 }
  0x7d   :  { %1735 = vmatprep.subr.msk.mxu1 %vm67_vm0, %v1893_v2  ;;  %214 = vmatprep.mubr.f32.mxu0 %v1842_v4  ;;  %v231_v17 = vsel %vm230_vm3, %v227_v13, %v229_v12 }
  0x7e   :  { %1736 = vmatpush1.msk.msra.mxu1 %vm67_vm0, %v1882_v0  ;;  %1024 = vmatprep.mubr.f32.mxu1 %v1842_v4  ;;  %v20_v0 = vadd.s32 128, %v19_v63  ;;  %vm45_vm10 = vcmp.lt.s32.totalorder %v25_v1, 14 }
  0x7f   :  { %1704 = vmatprep.subr.msk.mxu0 %vm67_vm0, %v229_v12  ;;  %v1694_v3 = vsel %vm45_vm10, 1.0, %v1842_v4 }
  0x80   :  { %v1037_v15 = vpop.permute.xlu1 %1036  ;;  %v1035_v16 = vpop.permute.xlu0 %1034  ;;  %v32_v2 = vand.u32 15, %v20_v0 }
  0x81   :  { %1739 = vmatprep.subr.msk.mxu1 %vm67_vm0, %v1037_v15  ;;  %v1038_v18 = vsel %vm230_vm3, %v1035_v16, %v1037_v15 }
  0x82   :  { %vm46_vm11 = vcmp.lt.s32.totalorder %v32_v2, 14 }
  0x83   :  { %1702 = vmatmul.mubr.msk.f32.vlgmr.msra.gmra.mrb[0].mxu0 %vm63_vm2, %v52_v14  ;;  %v1695_v5 = vsel %vm46_vm11, 1.0, %v1842_v4 }
  0x84   :  { %1737 = vmatmul.mubr.msk.f32.vlgmr.msra.gmra.mrb[0].mxu1 %vm63_vm2, %v52_v14  ;;  %1705 = vmatpush1.msk.msra.mxu0 %vm67_vm0, %v231_v17  ;;  %v320_v19 = vpop.permute.xlu1 %319  ;;  %v318_v20 = vpop.permute.xlu0 %317 }
  0x85   :  { %1740 = vmatpush1.msk.msra.mxu1 %vm67_vm0, %v1038_v18  ;;  %303 = vmatprep.mubr.f32.mxu0 %v1842_v4  ;;  %v322_v24 = vsel %vm321_vm4, %v318_v20, %v320_v19 }
  0x86   :  { %1107 = vmatprep.mubr.f32.mxu1 %v1842_v4  ;;  %1708 = vmatprep.subr.msk.mxu0 %vm67_vm0, %v320_v19 }
  0x88   :  { %v1122_v22 = vpop.permute.xlu1 %1121  ;;  %v1120_v23 = vpop.permute.xlu0 %1119 }
  0x89   :  { %1743 = vmatprep.subr.msk.mxu1 %vm67_vm0, %v1122_v22  ;;  %v1123_v25 = vsel %vm321_vm4, %v1120_v23, %v1122_v22 }
  0x8b   :  { %1706 = vmatmul.mubr.msk.f32.vlgmr.msra.gmra.mrb[0].mxu0 %vm63_vm2, %v1703_v21 }
  0x8c   :  { %1741 = vmatmul.mubr.msk.f32.vlgmr.msra.gmra.mrb[0].mxu1 %vm63_vm2, %v1703_v21  ;;  %1709 = vmatpush1.msk.msra.mxu0 %vm67_vm0, %v322_v24  ;;  %v411_v26 = vpop.permute.xlu1 %410  ;;  %v409_v27 = vpop.permute.xlu0 %408 }
  0x8d   :  { %1744 = vmatpush1.msk.msra.mxu1 %vm67_vm0, %v1123_v25  ;;  %394 = vmatprep.mubr.f32.mxu0 %v1842_v4  ;;  %v413_v31 = vsel %vm412_vm5, %v409_v27, %v411_v26  ;;  %v1850_v25 = vmov 0  }
  0x8e   :  { %1192 = vmatprep.mubr.f32.mxu1 %v1842_v4  ;;  %1712 = vmatprep.subr.msk.mxu0 %vm67_vm0, %v411_v26 }
  0x8f   :  { %1811 = vset.pattern.permute.xlu1 %v1850_v25  ;;  %1812 = vset.pattern.permute.xlu0 %v1850_v25 }
  0x90   :  { %v1207_v29 = vpop.permute.xlu1 %1206  ;;  %v1205_v30 = vpop.permute.xlu0 %1204 }
  0x91   :  { %1747 = vmatprep.subr.msk.mxu1 %vm67_vm0, %v1207_v29  ;;  %v1208_v32 = vsel %vm412_vm5, %v1205_v30, %v1207_v29 }
  0x93   :  { %1710 = vmatmul.mubr.msk.f32.vlgmr.msra.gmra.mrb[0].mxu0 %vm63_vm2, %v1707_v28 }
  0x94   :  { %1745 = vmatmul.mubr.msk.f32.vlgmr.msra.gmra.mrb[0].mxu1 %vm63_vm2, %v1707_v28  ;;  %1713 = vmatpush1.msk.msra.mxu0 %vm67_vm0, %v413_v31  ;;  %v502_v33 = vpop.permute.xlu1 %501  ;;  %v500_v34 = vpop.permute.xlu0 %499 }
  0x95   :  { %1748 = vmatpush1.msk.msra.mxu1 %vm67_vm0, %v1208_v32  ;;  %485 = vmatprep.mubr.f32.mxu0 %v1842_v4  ;;  %v504_v38 = vsel %vm503_vm6, %v500_v34, %v502_v33 }
  0x96   :  { %1277 = vmatprep.mubr.f32.mxu1 %v1842_v4  ;;  %1716 = vmatprep.subr.msk.mxu0 %vm67_vm0, %v502_v33 }
  0x98   :  { %v1292_v36 = vpop.permute.xlu1 %1291  ;;  %v1290_v37 = vpop.permute.xlu0 %1289 }
  0x99   :  { %1751 = vmatprep.subr.msk.mxu1 %vm67_vm0, %v1292_v36  ;;  %v1293_v39 = vsel %vm503_vm6, %v1290_v37, %v1292_v36  ;;  %v1644_v37 = vld [vmem:[%s2051_s2] sm:$0xff]  ;;  %s1817_s2 = scalar_lea.vmem %s1684_s21, 512 }
  0x9a   :  { %p1818_p0 = scmp.ne.s32.totalorder %s1684_s21, %s1817_s2  ;;  %p1823_p2 = scmp.lt.s32.totalorder %s1817_s2, %s1817_s2 }
  0x9b   :  { %1714 = vmatmul.mubr.msk.f32.vlgmr.msra.gmra.mrb[0].mxu0 %vm63_vm2, %v1711_v35 }
  0x9c   :  { %1749 = vmatmul.mubr.msk.f32.vlgmr.msra.gmra.mrb[0].mxu1 %vm63_vm2, %v1711_v35  ;;  %1717 = vmatpush1.msk.msra.mxu0 %vm67_vm0, %v504_v38  ;;  %v593_v40 = vpop.permute.xlu1 %592  ;;  %v591_v41 = vpop.permute.xlu0 %590  ;;  %p1824_p3 = por %p1823_p2, %p1822_p1 }
  0x9d   :  { %1752 = vmatpush1.msk.msra.mxu1 %vm67_vm0, %v1293_v39  ;;  %576 = vmatprep.mubr.f32.mxu0 %v1842_v4  ;;  %v595_v45 = vsel %vm594_vm7, %v591_v41, %v593_v40 }
  0x9e   :  { %1362 = vmatprep.mubr.f32.mxu1 %v1842_v4  ;;  %1720 = vmatprep.subr.msk.mxu0 %vm67_vm0, %v593_v40  ;;  %v1648_v40 = vld [vmem:[%s2052_s3] sm:$0xff]  ;;  %p1825_p4 = pnand %p1824_p3, %p1818_p0 }
  0xa0   :  { %v1377_v43 = vpop.permute.xlu1 %1376  ;;  %v1375_v44 = vpop.permute.xlu0 %1374 }
  0xa1   :  { %1755 = vmatprep.subr.msk.mxu1 %vm67_vm0, %v1377_v43  ;;  %v1378_v46 = vsel %vm594_vm7, %v1375_v44, %v1377_v43 }
  0xa3   :  { %1718 = vmatmul.mubr.msk.f32.vlgmr.msra.gmra.mrb[0].mxu0 %vm63_vm2, %v1715_v42 }
  0xa4   :  { %1753 = vmatmul.mubr.msk.f32.vlgmr.msra.gmra.mrb[0].mxu1 %vm63_vm2, %v1715_v42  ;;  %1721 = vmatpush1.msk.msra.mxu0 %vm67_vm0, %v595_v45  ;;  %v684_v47 = vpop.permute.xlu1 %683  ;;  %v682_v48 = vpop.permute.xlu0 %681 }
  0xa5   :  { %1756 = vmatpush1.msk.msra.mxu1 %vm67_vm0, %v1378_v46  ;;  %667 = vmatprep.mubr.f32.mxu0 %v1842_v4  ;;  %v686_v52 = vsel %vm685_vm8, %v682_v48, %v684_v47 }
  0xa6   :  { %1447 = vmatprep.mubr.f32.mxu1 %v1842_v4  ;;  %1724 = vmatprep.subr.msk.mxu0 %vm67_vm0, %v684_v47 }
  0xa8   :  { %v1462_v50 = vpop.permute.xlu1 %1461  ;;  %v1460_v51 = vpop.permute.xlu0 %1459 }
  0xa9   :  { %1759 = vmatprep.subr.msk.mxu1 %vm67_vm0, %v1462_v50  ;;  %v1463_v53 = vsel %vm685_vm8, %v1460_v51, %v1462_v50 }
  0xab   :  { %1722 = vmatmul.mubr.msk.f32.vlgmr.msra.gmra.mrb[0].mxu0 %vm63_vm2, %v1719_v49 }
  0xac   :  { %1757 = vmatmul.mubr.msk.f32.vlgmr.msra.gmra.mrb[0].mxu1 %vm63_vm2, %v1719_v49  ;;  %1725 = vmatpush1.msk.msra.mxu0 %vm67_vm0, %v686_v52  ;;  %v775_v54 = vpop.permute.xlu1 %774  ;;  %v773_v55 = vpop.permute.xlu0 %772 }
  0xad   :  { %1760 = vmatpush1.msk.msra.mxu1 %vm67_vm0, %v1463_v53  ;;  %758 = vmatprep.mubr.f32.mxu0 %v1842_v4  ;;  %v777_v59 = vsel %vm776_vm9, %v773_v55, %v775_v54 }
  0xae   :  { %1532 = vmatprep.mubr.f32.mxu1 %v1842_v4  ;;  %1728 = vmatprep.subr.msk.mxu0 %vm67_vm0, %v775_v54 }
  0xb0   :  { %v1547_v57 = vpop.permute.xlu1 %1546  ;;  %v1545_v58 = vpop.permute.xlu0 %1544 }
  0xb1   :  { %1763 = vmatprep.subr.msk.mxu1 %vm67_vm0, %v1547_v57  ;;  %v1548_v60 = vsel %vm776_vm9, %v1545_v58, %v1547_v57 }
  0xb3   :  { %1726 = vmatmul.mubr.msk.f32.vlgmr.msra.gmra.mrb[0].mxu0 %vm63_vm2, %v1723_v56 }
  0xb4   :  { %1761 = vmatmul.mubr.msk.f32.vlgmr.msra.gmra.mrb[0].mxu1 %vm63_vm2, %v1723_v56  ;;  %1729 = vmatpush1.msk.msra.mxu0 %vm67_vm0, %v777_v59 }
  0xb5   :  { %849 = vmatprep.mubr.f32.mxu0 %v1842_v4  ;;  %1764 = vmatpush1.msk.msra.mxu1 %vm67_vm0, %v1548_v60 }
  0xb6   :  { %1617 = vmatprep.mubr.f32.mxu1 %v1842_v4 }
  0xbb   :  { %1730 = vmatmul.mubr.msk.f32.vlgmr.msra.gmra.mrb[0].mxu0 %vm63_vm2, %v1727_v61 }
  0xbc   :  { %1765 = vmatmul.mubr.msk.f32.vlgmr.msra.gmra.mrb[0].mxu1 %vm63_vm2, %v1727_v61 }
 0x18e   :  { %v851_v6 = vpop.f32.mrb[0].mxu0 }
 0x18f   :  { %v1619_v7 = vpop.f32.mrb[0].mxu1  ;;  %v853_v8 = vpop.f32.mrb[1].mxu0  ;;  %v858_v9 = vmul.f32 %v1694_v3, %v851_v6 }
 0x190   :  { %v859_v10 = vmul.f32 %v1695_v5, %v853_v8  ;;  %v1621_v11 = vpop.f32.mrb[1].mxu1  ;;  %v1626_v12 = vmul.f32 %v1694_v3, %v1619_v7 }
 0x191   :  { %v1627_v13 = vmul.f32 %v1695_v5, %v1621_v11  ;;  %v865_v19 = vmul.f32 %v858_v9, %v851_v6 }
 0x192   :  { %v866_v14 = vmul.f32 %v859_v10, %v853_v8  ;;  %v860_v15 = vsel %vm776_vm9, %v859_v10, 0.0  ;;  %v1633_v4 = vmul.f32 %v1626_v12, %v1619_v7 }
 0x193   :  { %v1634_v16 = vmul.f32 %v1627_v13, %v1621_v11  ;;  %v1628_v17 = vsel %vm776_vm9, %v1627_v13, 0.0  ;;  %v861_v18 = vadd.f32 %v860_v15, %v858_v9 }
 0x194   :  { %v1629_v20 = vadd.f32 %v1628_v17, %v1626_v12  ;;  %v867_v21 = vsel %vm776_vm9, %v866_v14, 0.0 }
 0x195   :  { %862 = vadd.xlane.f32.xlu0 %v861_v18  ;;  %v868_v22 = vadd.f32 %v867_v21, %v865_v19  ;;  %v1635_v23 = vsel %vm776_vm9, %v1634_v16, 0.0 }
 0x196   :  { %1630 = vadd.xlane.f32.xlu1 %v1629_v20  ;;  %v1636_v24 = vadd.f32 %v1635_v23, %v1633_v4 }
 0x199   :  { %869 = vadd.xlane.f32.xlu0 %v868_v22 }
 0x19d   :  { %1637 = vadd.xlane.f32.xlu0 %v1636_v24 }
 0x222   :  { %v863_v26 = vpop.xlane.xlu0 %862 }
 0x223   :  { %v1631_v27 = vpop.xlane.xlu1 %1630 }
 0x224   :  { %v1632_v28 = vadd.f32 %v1631_v27, %v863_v26 }
 0x226   :  { %v870_v29 = vpop.xlane.xlu0 %869  ;;  %v1640_v30 = vmul.f32 0.0025510204, %v1632_v28 }
 0x228   :  { %v1642_v33 = vmul.f32 %v1640_v30, %v1640_v30 }
 0x22a   :  { %v1638_v31 = vpop.xlane.xlu0 %1637 }
 0x22b   :  { %v1639_v32 = vadd.f32 %v1638_v31, %v870_v29 }
 0x22d   :  { %v1641_v34 = vmul.f32 0.0025510204, %v1639_v32 }
 0x22f   :  { %v1643_v35 = vsub.f32 %v1641_v34, %v1642_v33 }
 0x231   :  { %v1645_v36 = vadd.f32 1e-05, %v1643_v35 }
 0x233   :  { %1815 = vrsqrt.f32 %v1645_v36 }
 0x23d   :  { %v1816_v38 = vpop.eup %1815 }
 0x23e   :  { %v1647_v39 = vmul.f32 %v1816_v38, %v1644_v37 }
 0x240   :  { %1653 = vperm.xlu1 %1811, %v1647_v39   ;;  %v1649_v41 = vmul.f32 %v1647_v39, %v1640_v30 }
 0x242   :  { %v1650_v42 = vsub.f32 %v1648_v40, %v1649_v41 }
 0x244   :  { %1660 = vperm.xlu0 %1812, %v1650_v42  }
 0x2bf   :  { %v1654_v43 = vpop.permute.xlu1 %1653 }
 0x2c0   :  { %v1656_v44 = vmul.f32 %v1654_v43, %v851_v6  ;;  %v1657_v45 = vmul.f32 %v1654_v43, %v853_v8  ;;  %v1669_v46 = vmul.f32 %v1654_v43, %v1619_v7  ;;  %v1670_v47 = vmul.f32 %v1654_v43, %v1621_v11 }
 0x2c3   :  { %v1661_v48 = vpop.permute.xlu0 %1660 }
 0x2c4   :  { %v1663_v49 = vadd.f32 %v1661_v48, %v1656_v44  ;;  %v1664_v50 = vadd.f32 %v1661_v48, %v1657_v45  ;;  %v1671_v51 = vadd.f32 %v1669_v46, %v1661_v48  ;;  %v1672_v52 = vadd.f32 %v1670_v47, %v1661_v48 }
 0x2c6   :  { %v1665_v53 = vmax.f32 %v1663_v49, 0.0  ;;  %v1666_v54 = vmax.f32 %v1664_v50, 0.0  ;;  %v1673_v55 = vmax.f32 %v1671_v51, 0.0  ;;  %v1674_v56 = vmax.f32 %v1672_v52, 0.0 }
 0x2c8   :  { %1667 = vst [vmem:[#allocation2] sm:$0xff] %v1665_v53  ;;  %1668 = vst.msk [vmem:[#allocation2 + $0x8] sm:$0xff] %vm776_vm9, %v1666_v54 }
 0x2c9   :  { %1676 = vst [vmem:[#allocation2 + $0x10] sm:$0xff] %v1673_v55  ;;  %1677 = vst.msk [vmem:[#allocation2 + $0x18] sm:$0xff] %vm776_vm9, %v1674_v56 }
 0x2ca   :  { %1828 = shalt.err (!%p1825_p4)
}
 0x2cb   :  { %s1829_s23 = scalar_lea.hbm %s2053_s4, 512 }
 0x2cc   :  { %p1830_p5 = scmp.ne.s32.totalorder %s2053_s4, %s1829_s23  ;;  %p1833_p6 = scmp.lt.u32.totalorder %s1829_s23, %s2053_s4 }
 0x2ce   :  { %p1835_p7 = pnand %p1833_p6, %p1830_p5 }
 0x2d0   :  { %1838 = shalt.err (!%p1835_p7)
}
 0x2d1   :  { %s1852_s28 = smov 256   ;;  %s1853_s29 = smov 16  }
 0x2d2   :  { %1689 = dma.vmem_to_hbm [thread:$0]  %s1684_s21, 512, %s2053_s4, [#allocation3], %s1852_s28, %s1852_s28, %s1853_s29  }
 0x2d3   :  { %1839 = dma.done.wait [#allocation3], 512  }
 0x2d4   :  { %1840 = vsyncadd [#allocation3], 4294966784 }
 0x2d5   :  { %1693 = vsyncpa [#allocation3], 1 }

</bundles_post_ra>
